<compile_context>
chip_gen: v5e
topology: v5e:2x2
jax: 0.10.0
libtpu: 0.0.40
codegen_flags: <defaults>
</compile_context>

<pallas_src>
import functools

import jax
import jax.numpy as jnp
from jax.experimental import pallas as pl
from jax.experimental.pallas import tpu as pltpu

_EPS = 1e-5  # torch.nn.InstanceNorm2d default eps
_LANE = 128


def _round_up(x, m):
    return ((x + m - 1) // m) * m


def _adain_kernel(x_ref, gamma_ref, beta_ref, o_ref, *, inv_hw):
    # x_ref/o_ref: (TR, HW) tile.  gamma_ref/beta_ref: (TR, 1) per-tile style params.
    x = x_ref[...].astype(jnp.float32)

    inv_hw = jnp.float32(inv_hw)
    mean = jnp.sum(x, axis=-1, keepdims=True) * inv_hw
    centered = x - mean
    var = jnp.sum(centered * centered, axis=-1, keepdims=True) * inv_hw
    inv_std = jax.lax.rsqrt(var + _EPS)

    gamma = gamma_ref[...].astype(jnp.float32)
    beta = beta_ref[...].astype(jnp.float32)
    scale = gamma * inv_std  # (TR, 1): fold gamma into the normalization scale
    o_ref[...] = (centered * scale + beta).astype(o_ref.dtype)


def adain(x, style):
    """x: (N, C, H, W), style: (N, 2*C).  Returns (N, C, H, W)."""
    N, C, H, W = x.shape
    assert style.shape == (N, 2 * C)
    HW = H * W
    NC = N * C

    itemsize = jnp.dtype(x.dtype).itemsize
    sublane = {4: 8, 2: 16, 1: 32}.get(itemsize, 8)

    # Per-generation VMEM budget (v5e/v6e: 128 MiB physical, v7x: 64 MiB per TC).
    try:
        vmem_cap = int(pltpu.get_tpu_info().vmem_capacity_bytes)
    except Exception:
        vmem_cap = 64 << 20  # conservative (v7x) fallback

    # Budget with the internal lane padding (VMEM tiles round HW up to 128 lanes).
    bytes_per_row = _round_up(HW, _LANE) * itemsize
    # Double-buffered input + output tiles -> 4 live (TR, HW) buffers; keep half of
    # VMEM as headroom for the compiler.
    tr_budget = ((vmem_cap // 2) // (4 * bytes_per_row)) // sublane * sublane
    tr_budget = max(tr_budget, sublane)
    # TODO(synk): for images so large that even TR=sublane overflows VMEM, add a
    # second "arbitrary" grid axis over HW (stats pass + apply pass).

    if NC <= sublane:
        # Single full-extent block along rows (valid even if NC % 8 != 0).
        TR = NC
    else:
        nc_aligned = _round_up(NC, sublane)
        TR = min(tr_budget, nc_aligned)
        # Keep >= 2 grid steps when possible so a megacore (v7x) can shard the grid.
        if TR >= nc_aligned and nc_aligned >= 2 * sublane:
            TR = _round_up((nc_aligned + 1) // 2, sublane)
    grid = (pl.cdiv(NC, TR),)

    # Glue: split style into per-instance gamma/beta columns; flatten x (no copies).
    gamma = style[:, :C].reshape(NC, 1)
    beta = style[:, C:].reshape(NC, 1)
    x2d = x.reshape(NC, HW)

    # VMEM limit sized to the chosen tile (double-buffered x + out, tiny gamma/beta).
    block_bytes = TR * bytes_per_row
    vmem_needed = 4 * block_bytes + (2 << 20)
    vmem_limit = int(min(vmem_cap * 9 // 10, max(vmem_needed, 16 << 20)))

    kernel = functools.partial(_adain_kernel, inv_hw=1.0 / HW)

    out2d = pl.pallas_call(
        kernel,
        out_shape=jax.ShapeDtypeStruct((NC, HW), x.dtype),
        grid_spec=pltpu.PrefetchScalarGridSpec(
            num_scalar_prefetch=0,
            grid=grid,
            in_specs=[
                pl.BlockSpec((TR, HW), lambda i: (i, 0)),
                pl.BlockSpec((TR, 1), lambda i: (i, 0)),
                pl.BlockSpec((TR, 1), lambda i: (i, 0)),
            ],
            out_specs=pl.BlockSpec((TR, HW), lambda i: (i, 0)),
        ),
        compiler_params=pltpu.CompilerParams(
            dimension_semantics=("parallel",),
            vmem_limit_bytes=vmem_limit,
        ),
    )(x2d, gamma, beta)

    return out2d.reshape(N, C, H, W)


def adain_reference(x, style):
    """Pure-JAX reference mirroring the PyTorch forward."""
    N, C, H, W = x.shape
    gamma = style[:, :C].reshape(N, C, 1, 1)
    beta = style[:, C:].reshape(N, C, 1, 1)
    mean = jnp.mean(x, axis=(2, 3), keepdims=True)
    var = jnp.mean((x - mean) ** 2, axis=(2, 3), keepdims=True)
    normed = (x - mean) / jnp.sqrt(var + _EPS)
    return gamma * normed + beta


if __name__ == "__main__":
    key = jax.random.PRNGKey(0)
    kx, ks = jax.random.split(key)

    N, C, H, W = 2, 4, 16, 16
    x = jax.random.normal(kx, (N, C, H, W), dtype=jnp.float32)
    style = jax.random.normal(ks, (N, 2 * C), dtype=jnp.float32)

    out = adain(x, style)
    out = jax.block_until_ready(out)

    ref = adain_reference(x, style)
    assert out.shape == (N, C, H, W)
    assert jnp.allclose(out, ref, atol=1e-4, rtol=1e-4), "mismatch vs reference"

    print("KERNEL_OK")
</pallas_src>

<mosaic_0001>
module attributes {stable_mosaic.version = 11 : i64} {
  func.func @_adain_kernel(%arg0: i32, %arg1: memref<8x256xf32, #tpu.memory_space<vmem>>, %arg2: memref<8x1xf32, #tpu.memory_space<vmem>>, %arg3: memref<8x1xf32, #tpu.memory_space<vmem>>, %arg4: memref<8x256xf32, #tpu.memory_space<vmem>>) attributes {dimension_semantics = [#tpu.dimension_semantics<parallel>], iteration_bounds = array<i64: 1>, scalar_prefetch = 0 : i64, scratch_operands = 0 : i64, tpu.core_type = #tpu.core_type<tc>, window_params = [{transform_indices = @transform_0, window_bounds = array<i64: 8, 256>}, {transform_indices = @transform_1, window_bounds = array<i64: 8, 1>}, {transform_indices = @transform_2, window_bounds = array<i64: 8, 1>}, {transform_indices = @transform_3, window_bounds = array<i64: 8, 256>}]} {
    %c0 = arith.constant 0 : index
    %c0_0 = arith.constant 0 : index
    %0 = vector.load %arg1[%c0, %c0_0] : memref<8x256xf32, #tpu.memory_space<vmem>>, vector<8x256xf32>
    %cst = arith.constant dense<0.000000e+00> : vector<8xf32>
    %1 = vector.multi_reduction <add>, %0, %cst [1] : vector<8x256xf32> to vector<8xf32>
    %2 = vector.shape_cast %1 : vector<8xf32> to vector<8x1xf32>
    %cst_1 = arith.constant 3.906250e-03 : f32
    %3 = vector.broadcast %cst_1 : f32 to vector<8x1xf32>
    %4 = arith.mulf %2, %3 : vector<8x1xf32>
    %5 = vector.broadcast %4 : vector<8x1xf32> to vector<8x256xf32>
    %6 = arith.subf %0, %5 : vector<8x256xf32>
    %7 = arith.mulf %6, %6 : vector<8x256xf32>
    %cst_2 = arith.constant dense<0.000000e+00> : vector<8xf32>
    %8 = vector.multi_reduction <add>, %7, %cst_2 [1] : vector<8x256xf32> to vector<8xf32>
    %9 = vector.shape_cast %8 : vector<8xf32> to vector<8x1xf32>
    %cst_3 = arith.constant 3.906250e-03 : f32
    %10 = vector.broadcast %cst_3 : f32 to vector<8x1xf32>
    %11 = arith.mulf %9, %10 : vector<8x1xf32>
    %cst_4 = arith.constant 9.99999974E-6 : f32
    %12 = vector.broadcast %cst_4 : f32 to vector<8x1xf32>
    %13 = arith.addf %11, %12 : vector<8x1xf32>
    %14 = math.rsqrt %13 : vector<8x1xf32>
    %c0_5 = arith.constant 0 : index
    %c0_6 = arith.constant 0 : index
    %15 = vector.load %arg2[%c0_5, %c0_6] : memref<8x1xf32, #tpu.memory_space<vmem>>, vector<8x1xf32>
    %c0_7 = arith.constant 0 : index
    %c0_8 = arith.constant 0 : index
    %16 = vector.load %arg3[%c0_7, %c0_8] : memref<8x1xf32, #tpu.memory_space<vmem>>, vector<8x1xf32>
    %17 = arith.mulf %15, %14 : vector<8x1xf32>
    %18 = vector.broadcast %17 : vector<8x1xf32> to vector<8x256xf32>
    %19 = arith.mulf %6, %18 : vector<8x256xf32>
    %20 = vector.broadcast %16 : vector<8x1xf32> to vector<8x256xf32>
    %21 = arith.addf %19, %20 : vector<8x256xf32>
    %c0_9 = arith.constant 0 : index
    %c0_10 = arith.constant 0 : index
    %22 = vector.load %arg4[%c0_9, %c0_10] : memref<8x256xf32, #tpu.memory_space<vmem>>, vector<8x256xf32>
    tpu.vector_store %arg4[%c0_9, %c0_10], %21 {strides = array<i32>} : memref<8x256xf32, #tpu.memory_space<vmem>>, vector<8x256xf32>,
    return
  }
  func.func @transform_0(%arg0: i32) -> (i32, i32) {
    %c0_i32 = arith.constant 0 : i32
    %c0_i32_0 = arith.constant 0 : i32
    return %arg0, %c0_i32 : i32, i32
  }
  func.func @transform_1(%arg0: i32) -> (i32, i32) {
    %c0_i32 = arith.constant 0 : i32
    %c0_i32_0 = arith.constant 0 : i32
    return %arg0, %c0_i32 : i32, i32
  }
  func.func @transform_2(%arg0: i32) -> (i32, i32) {
    %c0_i32 = arith.constant 0 : i32
    %c0_i32_0 = arith.constant 0 : i32
    return %arg0, %c0_i32 : i32, i32
  }
  func.func @transform_3(%arg0: i32) -> (i32, i32) {
    %c0_i32 = arith.constant 0 : i32
    %c0_i32_0 = arith.constant 0 : i32
    return %arg0, %c0_i32 : i32, i32
  }
}

</mosaic_0001>

<bundles_post_ra>
// kernel: tpu_custom_call.1
= control target key start
LH: loop header
LB: loop body
LE: loop exit
PB: predicated region body
PF: predicated region fallthrough
CT: control target
= control target key end

     0   :  { %s144_s0 = inlined_call_operand.vmem [shape: f32[8,256], index: 0, kind: input, shape index: {}]   ;;  %s145_s1 = inlined_call_operand.vmem [shape: f32[8,1], index: 1, kind: input, shape index: {}]   ;;  %s146_s2 = inlined_call_operand.vmem [shape: f32[8,1], index: 2, kind: input, shape index: {}]   ;;  %s147_s3 = inlined_call_operand.hbm [shape: f32[8,256], index: 3, kind: output, shape index: {}]  }
   0x1   :  { %v15_v0 = vld [vmem:[%s144_s0] sm:$0xff]  ;;  %v16_v1 = vld [vmem:[%s144_s0 + $0x8] sm:$0xff] }
   0x2   :  { %8 = vsyncpa [#allocation3], 0  ;;  %v17_v2 = vadd.f32 %v16_v1, %v15_v0  ;;  %v107_v10 = vmov 0   ;;  %v40_v20 = vld [vmem:[%s145_s1] sm:$0xff]  ;;  %s108_s19 = smov [#allocation2]   ;;  %s66_s23 = sshll.u32 %s147_s3, 4  ;;  %s67_s23 = int_to_ptr.hbm [resolvable:$true] %s66_s23 }
   0x3   :  { %77 = vset.pattern.permute.xlu1 %v107_v10  ;;  %78 = vset.pattern.permute.xlu0 %v107_v10  ;;  %v41_v23 = vld [vmem:[%s146_s2] sm:$0xff]  ;;  %s64_s20 = sshll.u32 %s108_s19, 4  ;;  %s65_s20 = int_to_ptr.vmem [resolvable:$true] %s64_s20 }
   0x4   :  { %18 = vadd.xlane.f32.xlu0 %v17_v2 }
  0x77   :  { %v19_v3 = vpop.xlane.xlu0 %18 }
  0x78   :  { %v20_v4 = vmul.f32 0.00390625, %v19_v3 }
  0x7a   :  { %v21_v5 = vsub.f32 %v15_v0, %v20_v4  ;;  %v22_v6 = vsub.f32 %v16_v1, %v20_v4 }
  0x7c   :  { %v23_v7 = vmul.f32 %v21_v5, %v21_v5  ;;  %v24_v8 = vmul.f32 %v22_v6, %v22_v6 }
  0x7e   :  { %v25_v9 = vadd.f32 %v24_v8, %v23_v7 }
  0x80   :  { %26 = vadd.xlane.f32.xlu0 %v25_v9 }
  0xf3   :  { %v27_v11 = vpop.xlane.xlu0 %26 }
  0xf4   :  { %v28_v12 = vmul.f32 0.00390625, %v27_v11 }
  0xf6   :  { %v29_v13 = vadd.f32 1e-05, %v28_v12 }
  0xf8   :  { %79 = vrsqrt.f32 %v29_v13  ;;  %vm36_vm1 = vweird.f32 %v29_v13 }
  0xfe   :  { %v80_v14 = vpop.eup %79 }
  0xff   :  { %v31_v15 = vmul.f32 %v80_v14, %v29_v13  ;;  %vm37_vm0 = vweird.f32 %v80_v14 }
 0x100   :  { %vm38_vm2 = vmor %vm36_vm1, %vm37_vm0 }
 0x101   :  { %v32_v16 = vmul.f32 %v80_v14, %v31_v15 }
 0x103   :  { %v33_v17 = vmul.f32 0.5, %v32_v16 }
 0x105   :  { %v34_v18 = vsub.f32 1.5, %v33_v17 }
 0x107   :  { %v35_v19 = vmul.f32 %v80_v14, %v34_v18 }
 0x109   :  { %v39_v21 = vsel %vm38_vm2, %v80_v14, %v35_v19 }
 0x10a   :  { %v42_v22 = vmul.f32 %v40_v20, %v39_v21 }
 0x10c   :  { %45 = vperm.xlu1 %77, %v42_v22  }
 0x114   :  { %52 = vperm.xlu1 %77, %v41_v23  }
 0x17e   :  { %v46_v24 = vpop.permute.xlu1 %45 }
 0x17f   :  { %v48_v25 = vmul.f32 %v46_v24, %v21_v5  ;;  %v49_v26 = vmul.f32 %v46_v24, %v22_v6 }
 0x186   :  { %v53_v27 = vpop.permute.xlu1 %52 }
 0x187   :  { %v55_v28 = vadd.f32 %v53_v27, %v48_v25  ;;  %v56_v29 = vadd.f32 %v53_v27, %v49_v26 }
 0x189   :  { %57 = vst [vmem:[#allocation2] sm:$0xff] %v55_v28 }
 0x18a   :  { %58 = vst [vmem:[#allocation2 + $0x8] sm:$0xff] %v56_v29 }
 0x18b   :  { %69 = dma.vmem_to_hbm [thread:$0]  %s65_s20, 256, %s67_s23, [#allocation3]  }
 0x18c   :  { %105 = dma.done.wait [#allocation3], 256  }
 0x18d   :  { %106 = vsyncadd [#allocation3], 4294967040 }
 0x18e   :  { %74 = vsyncpa [#allocation3], 1 }

</bundles_post_ra>
